<compile_context>
chip_gen: v5e
topology: v5e:2x2
jax: 0.10.0
libtpu: 0.0.40
codegen_flags: <defaults>
</compile_context>

<pallas_src>
import functools

import jax
import jax.numpy as jnp
from jax.experimental import pallas as pl
from jax.experimental.pallas import tpu as pltpu


def _round_up(x, m):
    return ((x + m - 1) // m) * m


def _debias_supcon_kernel(qf_ref, kf_ref, row_meta_ref, col_meta_ref, col_bias_ref,
                          out_ref, m_sc, l_sc, sml_sc,
                          *, inv_temp, n_pad, k_is_dxn):
    i = pl.program_id(0)            # anchor (row) block — "parallel"
    kk = pl.program_id(1)           # contrast (key) block — reduction axis
    nk = pl.num_programs(1)

    @pl.when(kk == 0)
    def _init():
        m_sc[...] = jnp.full_like(m_sc, -jnp.inf)
        l_sc[...] = jnp.zeros_like(l_sc)
        sml_sc[...] = jnp.zeros_like(sml_sc)

    # logits tile: (q / temperature) @ k on the MXU (bf16 in, f32 accumulate).
    # Scale in f32 then cast so the temperature factor adds no bf16 bias.
    q = (qf_ref[...].astype(jnp.float32) * inv_temp).astype(kf_ref.dtype)   # [TM, D]
    if k_is_dxn:
        dn = (((1,), (0,)), ((), ()))     # [TM, D] x [D, TC] (lane-dense keys)
    else:
        dn = (((1,), (1,)), ((), ()))     # [TM, D] x [TC, D], contract features
    s = jax.lax.dot_general(q, kf_ref[...], dimension_numbers=dn,
                            preferred_element_type=jnp.float32)             # [TM, TC]
    tm, tc = s.shape

    if n_pad:
        # Padded key columns carry a -1e30 additive bias (finite on purpose:
        # 0 * (-1e30) in the masked-logit sum stays finite); valid columns +0.
        s = s + col_bias_ref[...]

    # Positive-pair mask rebuilt on the fly: same label AND different bias.
    # Diagonal is never positive (bias equals itself); padded columns carry a
    # sentinel label, so no extra logits_mask / col_valid terms are needed.
    lab_i = row_meta_ref[:, 0:1]                                  # [TM, 1] int32
    bia_i = row_meta_ref[:, 1:2]
    lab_j = col_meta_ref[0:1, :]                                  # [1, TC] int32
    bia_j = col_meta_ref[1:2, :]
    mask_f = jnp.logical_and(lab_i == lab_j, bia_i != bia_j).astype(jnp.float32)

    # Online row-max / exp-sum (reference max is over raw logits incl. diagonal).
    m_prev = m_sc[...]
    m_new = jnp.maximum(m_prev, jnp.max(s, axis=1, keepdims=True))
    alpha = jnp.exp(m_prev - m_new)
    p = jnp.exp(s - m_new)
    l_sc[...] = alpha * l_sc[...] + jnp.sum(p, axis=1, keepdims=True)
    m_sc[...] = m_new

    # Masked-logit partial sums (linear in logits => no flash rescaling).
    sml_sc[...] = sml_sc[...] + jnp.sum(mask_f * s, axis=1, keepdims=True)

    # Self-contrast removal only on blocks whose row/col ranges overlap the
    # global diagonal: subtract the diagonal's exp contribution from l.
    row0 = i * tm
    col0 = kk * tc
    @pl.when(jnp.logical_and(row0 < col0 + tc, col0 < row0 + tm))
    def _remove_diag():
        r_glob = row0 + jax.lax.broadcasted_iota(jnp.int32, (tm, tc), 0)
        c_glob = col0 + jax.lax.broadcasted_iota(jnp.int32, (tm, tc), 1)
        diag_p = jnp.where(r_glob == c_glob, p, 0.0)
        l_sc[...] = l_sc[...] - jnp.sum(diag_p, axis=1, keepdims=True)

    @pl.when(kk == nk - 1)
    def _finalize():
        m = m_sc[...]
        log_denom = jnp.log(l_sc[...] + 1e-9)
        smask = row_meta_ref[:, 2:3].astype(jnp.float32)   # precomputed sum(mask)
        smask_safe = jnp.where(smask == 0.0, 1.0, smask)
        # sum(mask*log_prob) = sum(mask*logits) - sum(mask)*(m + log(denom))
        mean_log_prob_pos = (sml_sc[...] - smask * (m + log_denom)) / smask_safe
        out_ref[...] = -mean_log_prob_pos


def _choose_tiles(N, D):
    """(anchor tile TM, key tile TC); one always divides the other."""
    if N <= 256:
        t = _round_up(N, 8)
        return t, t
    tc = 256
    if D >= 256 and N >= 2048:
        tm = 512            # cut key re-streaming when the key stream dominates
    elif N <= 512:
        tm = 128            # >= 2 row blocks keeps both v7x TensorCores busy
    else:
        tm = 256
    return tm, tc


def debias_supcon_loss(features, labels, biases, temperature=0.07,
                       contrast_mode='all', base_temperature=0.07,
                       matmul_dtype=jnp.bfloat16):
    """features: [B, V, D] float, labels/biases: [B] int. contrast_mode='all'."""
    # TODO(synk): contrast_mode='one' and the explicit precomputed-`mask`
    # argument path of the PyTorch module are not implemented.
    assert contrast_mode == 'all'
    del base_temperature  # the reference module's forward never uses it
    B, V, D = features.shape
    N = B * V

    # contrast_feature = torch.cat(torch.unbind(features, dim=1), dim=0)  (view-major)
    cf = jnp.swapaxes(features, 0, 1).reshape(N, D).astype(matmul_dtype)
    lab_b = labels.reshape(-1).astype(jnp.int32)
    bia_b = biases.reshape(-1).astype(jnp.int32)
    lab = jnp.tile(lab_b, V)                                      # [N] view-major
    bia = jnp.tile(bia_b, V)

    # Per-anchor sum(mask) hoisted out of the kernel (B x B compare, not N x N):
    # sum_j mask[r, j] = V * (count(label==lab_r) - count(label==lab_r & bias==bia_r))
    same_lab = lab_b[:, None] == lab_b[None, :]
    same_lab_bias = jnp.logical_and(same_lab, bia_b[:, None] == bia_b[None, :])
    pos_cnt_b = (jnp.sum(same_lab, axis=1) - jnp.sum(same_lab_bias, axis=1)) * V
    smask = jnp.tile(pos_cnt_b.astype(jnp.int32), V)              # [N]

    tm, tc = _choose_tiles(N, D)
    n_total = _round_up(N, max(tm, tc))
    pad = n_total - N
    if pad:
        sentinel = int(jnp.iinfo(jnp.int32).min)   # padded cols never match a label
        cf = jnp.pad(cf, ((0, pad), (0, 0)))
        lab = jnp.pad(lab, (0, pad), constant_values=sentinel)
        bia = jnp.pad(bia, (0, pad))
        smask = jnp.pad(smask, (0, pad))

    row_meta = jnp.stack([lab, bia, smask], axis=1)               # [Npad, 3] int32
    col_meta = jnp.stack([lab, bia], axis=0)                      # [2, Npad] int32
    col_bias = jnp.where(jnp.arange(n_total, dtype=jnp.int32) < N,
                         jnp.float32(0.0), jnp.float32(-1e30)).reshape(1, n_total)

    # Lane-dense key layout for small feature dims: [D, Npad] so keys sit on
    # the 128-lane axis and the dot is plain NN form.
    k_is_dxn = D < 128
    if k_is_dxn:
        kf = cf.T                                                 # [D, Npad]
        kf_spec = pl.BlockSpec((D, tc), lambda i, k: (0, k))
    else:
        kf = cf                                                   # [Npad, D]
        kf_spec = pl.BlockSpec((tc, D), lambda i, k: (k, 0))

    kernel = functools.partial(_debias_supcon_kernel,
                               inv_temp=float(1.0 / temperature),
                               n_pad=pad, k_is_dxn=k_is_dxn)

    per_row = pl.pallas_call(
        kernel,
        out_shape=jax.ShapeDtypeStruct((n_total, 1), jnp.float32),
        grid_spec=pltpu.PrefetchScalarGridSpec(
            num_scalar_prefetch=0,
            grid=(n_total // tm, n_total // tc),                  # (rows, keys)
            in_specs=[
                pl.BlockSpec((tm, D), lambda i, k: (i, 0)),       # anchor rows
                kf_spec,                                          # contrast keys
                pl.BlockSpec((tm, 3), lambda i, k: (i, 0)),       # row label/bias/sum(mask)
                pl.BlockSpec((2, tc), lambda i, k: (0, k)),       # col label/bias
                pl.BlockSpec((1, tc), lambda i, k: (0, k)),       # col padding bias
            ],
            out_specs=pl.BlockSpec((tm, 1), lambda i, k: (i, 0)),
            scratch_shapes=[pltpu.VMEM((tm, 1), jnp.float32)] * 3,  # m, l, sml
        ),
        compiler_params=pltpu.CompilerParams(
            dimension_semantics=("parallel", "arbitrary"),
            # Chosen tiles use only a few MiB; 32 MiB is safe on v5e/v6e
            # (128 MiB VMEM) and v7x (64 MiB VMEM).
            vmem_limit_bytes=32 * 1024 * 1024,
        ),
    )(cf, kf, row_meta, col_meta, col_bias)

    # Padded rows are dropped; mean over the N real anchors (matches loss.mean()).
    return jnp.sum(per_row[:N, 0]) / jnp.float32(N)


def _reference_loss(features, labels, biases, temperature=0.07):
    # Pure-JAX reference mirroring the PyTorch forward exactly (f32 throughout).
    B, V, D = features.shape
    N = B * V
    lab = labels.reshape(-1, 1)
    bia = biases.reshape(-1, 1)
    mask = ((lab == lab.T) & (bia != bia.T)).astype(jnp.float32)
    cf = jnp.swapaxes(features, 0, 1).reshape(N, D)
    adc = (cf @ cf.T) / temperature
    logits = adc - jnp.max(adc, axis=1, keepdims=True)
    mask = jnp.tile(mask, (V, V))
    logits_mask = 1.0 - jnp.eye(N, dtype=jnp.float32)
    mask = mask * logits_mask
    exp_logits = jnp.exp(logits) * logits_mask
    log_prob = logits - jnp.log(jnp.sum(exp_logits, axis=1, keepdims=True) + 1e-9)
    sum_mask = jnp.sum(mask, axis=1)
    sum_mask = jnp.where(sum_mask == 0, 1.0, sum_mask)
    mlpp = jnp.sum(mask * log_prob, axis=1) / sum_mask
    return jnp.mean(-mlpp)


if __name__ == "__main__":
    keys = jax.random.split(jax.random.PRNGKey(0), 6)

    # --- small shape (single tile, no padding) ---
    B, V, D = 8, 2, 32
    features = jax.random.normal(keys[0], (B, V, D), dtype=jnp.float32)
    features = features / jnp.linalg.norm(features, axis=-1, keepdims=True)
    labels = jax.random.randint(keys[1], (B,), 0, 2, dtype=jnp.int32)
    biases = jax.random.randint(keys[2], (B,), 0, 2, dtype=jnp.int32)
    ref = jax.block_until_ready(_reference_loss(features, labels, biases))

    # precision path (f32 MXU inputs): tight tolerance vs. f32 reference
    loss_f32 = jax.block_until_ready(
        debias_supcon_loss(features, labels, biases, matmul_dtype=jnp.float32))
    assert jnp.allclose(loss_f32, ref, atol=1e-4, rtol=1e-3), (loss_f32, ref)

    # default bf16 MXU path: looser tolerance (bf16 feature quantization only)
    loss_bf16 = jax.block_until_ready(debias_supcon_loss(features, labels, biases))
    assert jnp.allclose(loss_bf16, ref, atol=5e-2, rtol=1e-2), (loss_bf16, ref)

    # --- multi-tile shape: N=300 -> TM=128 / TC=256, 4x2 grid, streaming LSE,
    #     diagonal-overlap gating with TM != TC, and padded tail columns ---
    B2, V2, D2 = 150, 2, 32
    f2 = jax.random.normal(keys[3], (B2, V2, D2), dtype=jnp.float32)
    f2 = f2 / jnp.linalg.norm(f2, axis=-1, keepdims=True)
    l2 = jax.random.randint(keys[4], (B2,), 0, 3, dtype=jnp.int32)
    b2 = jax.random.randint(keys[5], (B2,), 0, 2, dtype=jnp.int32)
    ref2 = jax.block_until_ready(_reference_loss(f2, l2, b2))

    loss2_f32 = jax.block_until_ready(
        debias_supcon_loss(f2, l2, b2, matmul_dtype=jnp.float32))
    assert jnp.allclose(loss2_f32, ref2, atol=1e-4, rtol=1e-3), (loss2_f32, ref2)

    loss2_bf16 = jax.block_until_ready(debias_supcon_loss(f2, l2, b2))
    assert jnp.allclose(loss2_bf16, ref2, atol=5e-2, rtol=1e-2), (loss2_bf16, ref2)

    print("KERNEL_OK")
</pallas_src>

<mosaic_0001>
module attributes {stable_mosaic.version = 11 : i64} {
  func.func @_debias_supcon_kernel(%arg0: i32, %arg1: i32, %arg2: memref<16x32xf32, #tpu.memory_space<vmem>>, %arg3: memref<32x16xf32, #tpu.memory_space<vmem>>, %arg4: memref<16x3xi32, #tpu.memory_space<vmem>>, %arg5: memref<2x16xi32, #tpu.memory_space<vmem>>, %arg6: memref<1x16xf32, #tpu.memory_space<vmem>>, %arg7: memref<16x1xf32, #tpu.memory_space<vmem>>, %arg8: memref<16x1xf32, #tpu.memory_space<vmem>>, %arg9: memref<16x1xf32, #tpu.memory_space<vmem>>, %arg10: memref<16x1xf32, #tpu.memory_space<vmem>>) attributes {dimension_semantics = [#tpu.dimension_semantics<parallel>, #tpu.dimension_semantics<arbitrary>], iteration_bounds = array<i64: 1, 1>, scalar_prefetch = 0 : i64, scratch_operands = 3 : i64, tpu.core_type = #tpu.core_type<tc>, window_params = [{transform_indices = @transform_0, window_bounds = array<i64: 16, 32>}, {transform_indices = @transform_1, window_bounds = array<i64: 32, 16>}, {transform_indices = @transform_2, window_bounds = array<i64: 16, 3>}, {transform_indices = @transform_3, window_bounds = array<i64: 2, 16>}, {transform_indices = @transform_4, window_bounds = array<i64: 1, 16>}, {transform_indices = @transform_5, window_bounds = array<i64: 16, 1>}]} {
    %c0_i32 = arith.constant 0 : i32
    %0 = arith.cmpi eq, %arg1, %c0_i32 : i32
    %1 = arith.extui %0 : i1 to i32
    %c0_i32_0 = arith.constant 0 : i32
    %2 = arith.cmpi ne, %1, %c0_i32_0 : i32
    scf.if %2 {
      %cst_33 = arith.constant 0xFF800000 : f32
      %55 = vector.broadcast %cst_33 : f32 to vector<16x1xf32>
      %c0_34 = arith.constant 0 : index
      %c0_35 = arith.constant 0 : index
      %56 = vector.load %arg8[%c0_34, %c0_35] : memref<16x1xf32, #tpu.memory_space<vmem>>, vector<16x1xf32>
      tpu.vector_store %arg8[%c0_34, %c0_35], %55 {strides = array<i32>} : memref<16x1xf32, #tpu.memory_space<vmem>>, vector<16x1xf32>,
      %cst_36 = arith.constant 0.000000e+00 : f32
      %57 = vector.broadcast %cst_36 : f32 to vector<16x1xf32>
      %c0_37 = arith.constant 0 : index
      %c0_38 = arith.constant 0 : index
      %58 = vector.load %arg9[%c0_37, %c0_38] : memref<16x1xf32, #tpu.memory_space<vmem>>, vector<16x1xf32>
      tpu.vector_store %arg9[%c0_37, %c0_38], %57 {strides = array<i32>} : memref<16x1xf32, #tpu.memory_space<vmem>>, vector<16x1xf32>,
      %cst_39 = arith.constant 0.000000e+00 : f32
      %59 = vector.broadcast %cst_39 : f32 to vector<16x1xf32>
      %c0_40 = arith.constant 0 : index
      %c0_41 = arith.constant 0 : index
      %60 = vector.load %arg10[%c0_40, %c0_41] : memref<16x1xf32, #tpu.memory_space<vmem>>, vector<16x1xf32>
      tpu.vector_store %arg10[%c0_40, %c0_41], %59 {strides = array<i32>} : memref<16x1xf32, #tpu.memory_space<vmem>>, vector<16x1xf32>,
    } else {
    }
    %c0 = arith.constant 0 : index
    %c0_1 = arith.constant 0 : index
    %3 = vector.load %arg2[%c0, %c0_1] : memref<16x32xf32, #tpu.memory_space<vmem>>, vector<16x32xf32>
    %cst = arith.constant 14.2857141 : f32
    %4 = vector.broadcast %cst : f32 to vector<16x32xf32>
    %5 = arith.mulf %3, %4 : vector<16x32xf32>
    %c0_2 = arith.constant 0 : index
    %c0_3 = arith.constant 0 : index
    %6 = vector.load %arg3[%c0_2, %c0_3] : memref<32x16xf32, #tpu.memory_space<vmem>>, vector<32x16xf32>
    %cst_4 = arith.constant dense<0.000000e+00> : vector<16x16xf32>
    %7 = tpu.matmul %5, %6, %cst_4 {dimension_numbers = #tpu.dot_dimension_numbers<[1], [0], [0], [1], [0, 0, 1, 1], [], []>} : vector<16x32xf32>, vector<32x16xf32>, vector<16x16xf32> -> vector<16x16xf32>
    %c0_5 = arith.constant 0 : index
    %c0_6 = arith.constant 0 : index
    %8 = vector.load %arg4[%c0_5, %c0_6] : memref<16x3xi32, #tpu.memory_space<vmem>>, vector<16x1xi32>
    %c0_7 = arith.constant 0 : index
    %c1 = arith.constant 1 : index
    %9 = vector.load %arg4[%c0_7, %c1] : memref<16x3xi32, #tpu.memory_space<vmem>>, vector<16x1xi32>
    %c0_8 = arith.constant 0 : index
    %c0_9 = arith.constant 0 : index
    %10 = vector.load %arg5[%c0_8, %c0_9] : memref<2x16xi32, #tpu.memory_space<vmem>>, vector<1x16xi32>
    %c1_10 = arith.constant 1 : index
    %c0_11 = arith.constant 0 : index
    %11 = vector.load %arg5[%c1_10, %c0_11] : memref<2x16xi32, #tpu.memory_space<vmem>>, vector<1x16xi32>
    %12 = vector.broadcast %8 : vector<16x1xi32> to vector<16x16xi32>
    %13 = vector.broadcast %10 : vector<1x16xi32> to vector<16x16xi32>
    %14 = arith.cmpi eq, %12, %13 : vector<16x16xi32>
    %15 = vector.broadcast %9 : vector<16x1xi32> to vector<16x16xi32>
    %16 = vector.broadcast %11 : vector<1x16xi32> to vector<16x16xi32>
    %17 = arith.cmpi ne, %15, %16 : vector<16x16xi32>
    %18 = arith.andi %14, %17 : vector<16x16xi1>
    %19 = arith.extui %18 : vector<16x16xi1> to vector<16x16xi32>
    %20 = arith.sitofp %19 : vector<16x16xi32> to vector<16x16xf32>
    %c0_12 = arith.constant 0 : index
    %c0_13 = arith.constant 0 : index
    %21 = vector.load %arg8[%c0_12, %c0_13] : memref<16x1xf32, #tpu.memory_space<vmem>>, vector<16x1xf32>
    %cst_14 = arith.constant dense<0xFF800000> : vector<16xf32>
    %22 = vector.multi_reduction <maximumf>, %7, %cst_14 [1] : vector<16x16xf32> to vector<16xf32>
    %23 = vector.shape_cast %22 : vector<16xf32> to vector<16x1xf32>
    %24 = arith.maximumf %21, %23 : vector<16x1xf32>
    %25 = arith.subf %21, %24 : vector<16x1xf32>
    %26 = math.exp %25 : vector<16x1xf32>
    %27 = vector.broadcast %24 : vector<16x1xf32> to vector<16x16xf32>
    %28 = arith.subf %7, %27 : vector<16x16xf32>
    %29 = math.exp %28 : vector<16x16xf32>
    %c0_15 = arith.constant 0 : index
    %c0_16 = arith.constant 0 : index
    %30 = vector.load %arg9[%c0_15, %c0_16] : memref<16x1xf32, #tpu.memory_space<vmem>>, vector<16x1xf32>
    %31 = arith.mulf %26, %30 : vector<16x1xf32>
    %cst_17 = arith.constant dense<0.000000e+00> : vector<16xf32>
    %32 = vector.multi_reduction <add>, %29, %cst_17 [1] : vector<16x16xf32> to vector<16xf32>
    %33 = vector.shape_cast %32 : vector<16xf32> to vector<16x1xf32>
    %34 = arith.addf %31, %33 : vector<16x1xf32>
    %c0_18 = arith.constant 0 : index
    %c0_19 = arith.constant 0 : index
    %35 = vector.load %arg9[%c0_18, %c0_19] : memref<16x1xf32, #tpu.memory_space<vmem>>, vector<16x1xf32>
    tpu.vector_store %arg9[%c0_18, %c0_19], %34 {strides = array<i32>} : memref<16x1xf32, #tpu.memory_space<vmem>>, vector<16x1xf32>,
    %c0_20 = arith.constant 0 : index
    %c0_21 = arith.constant 0 : index
    %36 = vector.load %arg8[%c0_20, %c0_21] : memref<16x1xf32, #tpu.memory_space<vmem>>, vector<16x1xf32>
    tpu.vector_store %arg8[%c0_20, %c0_21], %24 {strides = array<i32>} : memref<16x1xf32, #tpu.memory_space<vmem>>, vector<16x1xf32>,
    %c0_22 = arith.constant 0 : index
    %c0_23 = arith.constant 0 : index
    %37 = vector.load %arg10[%c0_22, %c0_23] : memref<16x1xf32, #tpu.memory_space<vmem>>, vector<16x1xf32>
    %38 = arith.mulf %20, %7 : vector<16x16xf32>
    %cst_24 = arith.constant dense<0.000000e+00> : vector<16xf32>
    %39 = vector.multi_reduction <add>, %38, %cst_24 [1] : vector<16x16xf32> to vector<16xf32>
    %40 = vector.shape_cast %39 : vector<16xf32> to vector<16x1xf32>
    %41 = arith.addf %37, %40 : vector<16x1xf32>
    %c0_25 = arith.constant 0 : index
    %c0_26 = arith.constant 0 : index
    %42 = vector.load %arg10[%c0_25, %c0_26] : memref<16x1xf32, #tpu.memory_space<vmem>>, vector<16x1xf32>
    tpu.vector_store %arg10[%c0_25, %c0_26], %41 {strides = array<i32>} : memref<16x1xf32, #tpu.memory_space<vmem>>, vector<16x1xf32>,
    %c16_i32 = arith.constant 16 : i32
    %43 = arith.muli %arg0, %c16_i32 : i32
    %c16_i32_27 = arith.constant 16 : i32
    %44 = arith.muli %arg1, %c16_i32_27 : i32
    %c16_i32_28 = arith.constant 16 : i32
    %45 = arith.addi %44, %c16_i32_28 : i32
    %46 = arith.cmpi slt, %43, %45 : i32
    %c16_i32_29 = arith.constant 16 : i32
    %47 = arith.addi %43, %c16_i32_29 : i32
    %48 = arith.cmpi slt, %44, %47 : i32
    %49 = arith.andi %46, %48 : i1
    %50 = arith.extui %49 : i1 to i32
    %c0_i32_30 = arith.constant 0 : i32
    %51 = arith.cmpi ne, %50, %c0_i32_30 : i32
    scf.if %51 {
      %55 = tpu.iota {dimensions = array<i32: 0>} : vector<16x16xi32>
      %56 = vector.broadcast %43 : i32 to vector<16x16xi32>
      %57 = arith.addi %56, %55 : vector<16x16xi32>
      %58 = tpu.iota {dimensions = array<i32: 1>} : vector<16x16xi32>
      %59 = vector.broadcast %44 : i32 to vector<16x16xi32>
      %60 = arith.addi %59, %58 : vector<16x16xi32>
      %61 = arith.cmpi eq, %57, %60 : vector<16x16xi32>
      %cst_33 = arith.constant 0.000000e+00 : f32
      %62 = vector.broadcast %cst_33 : f32 to vector<16x16xf32>
      %63 = arith.select %61, %29, %62 : vector<16x16xi1>, vector<16x16xf32>
      %c0_34 = arith.constant 0 : index
      %c0_35 = arith.constant 0 : index
      %64 = vector.load %arg9[%c0_34, %c0_35] : memref<16x1xf32, #tpu.memory_space<vmem>>, vector<16x1xf32>
      %cst_36 = arith.constant dense<0.000000e+00> : vector<16xf32>
      %65 = vector.multi_reduction <add>, %63, %cst_36 [1] : vector<16x16xf32> to vector<16xf32>
      %66 = vector.shape_cast %65 : vector<16xf32> to vector<16x1xf32>
      %67 = arith.subf %64, %66 : vector<16x1xf32>
      %c0_37 = arith.constant 0 : index
      %c0_38 = arith.constant 0 : index
      %68 = vector.load %arg9[%c0_37, %c0_38] : memref<16x1xf32, #tpu.memory_space<vmem>>, vector<16x1xf32>
      tpu.vector_store %arg9[%c0_37, %c0_38], %67 {strides = array<i32>} : memref<16x1xf32, #tpu.memory_space<vmem>>, vector<16x1xf32>,
    } else {
    }
    %c0_i32_31 = arith.constant 0 : i32
    %52 = arith.cmpi eq, %arg1, %c0_i32_31 : i32
    %53 = arith.extui %52 : i1 to i32
    %c0_i32_32 = arith.constant 0 : i32
    %54 = arith.cmpi ne, %53, %c0_i32_32 : i32
    scf.if %54 {
      %c0_33 = arith.constant 0 : index
      %c0_34 = arith.constant 0 : index
      %55 = vector.load %arg8[%c0_33, %c0_34] : memref<16x1xf32, #tpu.memory_space<vmem>>, vector<16x1xf32>
      %c0_35 = arith.constant 0 : index
      %c0_36 = arith.constant 0 : index
      %56 = vector.load %arg9[%c0_35, %c0_36] : memref<16x1xf32, #tpu.memory_space<vmem>>, vector<16x1xf32>
      %cst_37 = arith.constant 9.99999971E-10 : f32
      %57 = vector.broadcast %cst_37 : f32 to vector<16x1xf32>
      %58 = arith.addf %56, %57 : vector<16x1xf32>
      %59 = math.log %58 : vector<16x1xf32>
      %c0_38 = arith.constant 0 : index
      %c2 = arith.constant 2 : index
      %60 = vector.load %arg4[%c0_38, %c2] : memref<16x3xi32, #tpu.memory_space<vmem>>, vector<16x1xi32>
      %61 = arith.sitofp %60 : vector<16x1xi32> to vector<16x1xf32>
      %cst_39 = arith.constant 0.000000e+00 : f32
      %62 = vector.broadcast %cst_39 : f32 to vector<16x1xf32>
      %63 = arith.cmpf oeq, %61, %62 : vector<16x1xf32>
      %cst_40 = arith.constant 1.000000e+00 : f32
      %64 = vector.broadcast %cst_40 : f32 to vector<16x1xf32>
      %65 = arith.select %63, %64, %61 : vector<16x1xi1>, vector<16x1xf32>
      %c0_41 = arith.constant 0 : index
      %c0_42 = arith.constant 0 : index
      %66 = vector.load %arg10[%c0_41, %c0_42] : memref<16x1xf32, #tpu.memory_space<vmem>>, vector<16x1xf32>
      %67 = arith.addf %55, %59 : vector<16x1xf32>
      %68 = arith.mulf %61, %67 : vector<16x1xf32>
      %69 = arith.subf %66, %68 : vector<16x1xf32>
      %70 = arith.divf %69, %65 : vector<16x1xf32>
      %cst_43 = arith.constant 0.000000e+00 : f32
      %71 = vector.broadcast %cst_43 : f32 to vector<16x1xf32>
      %72 = arith.subf %71, %70 : vector<16x1xf32>
      %c0_44 = arith.constant 0 : index
      %c0_45 = arith.constant 0 : index
      %73 = vector.load %arg7[%c0_44, %c0_45] : memref<16x1xf32, #tpu.memory_space<vmem>>, vector<16x1xf32>
      tpu.vector_store %arg7[%c0_44, %c0_45], %72 {strides = array<i32>} : memref<16x1xf32, #tpu.memory_space<vmem>>, vector<16x1xf32>,
    } else {
    }
    return
  }
  func.func @transform_0(%arg0: i32, %arg1: i32) -> (i32, i32) {
    %c0_i32 = arith.constant 0 : i32
    %c0_i32_0 = arith.constant 0 : i32
    return %arg0, %c0_i32 : i32, i32
  }
  func.func @transform_1(%arg0: i32, %arg1: i32) -> (i32, i32) {
    %c0_i32 = arith.constant 0 : i32
    %c0_i32_0 = arith.constant 0 : i32
    return %c0_i32, %arg1 : i32, i32
  }
  func.func @transform_2(%arg0: i32, %arg1: i32) -> (i32, i32) {
    %c0_i32 = arith.constant 0 : i32
    %c0_i32_0 = arith.constant 0 : i32
    return %arg0, %c0_i32 : i32, i32
  }
  func.func @transform_3(%arg0: i32, %arg1: i32) -> (i32, i32) {
    %c0_i32 = arith.constant 0 : i32
    %c0_i32_0 = arith.constant 0 : i32
    return %c0_i32, %arg1 : i32, i32
  }
  func.func @transform_4(%arg0: i32, %arg1: i32) -> (i32, i32) {
    %c0_i32 = arith.constant 0 : i32
    %c0_i32_0 = arith.constant 0 : i32
    return %c0_i32, %arg1 : i32, i32
  }
  func.func @transform_5(%arg0: i32, %arg1: i32) -> (i32, i32) {
    %c0_i32 = arith.constant 0 : i32
    %c0_i32_0 = arith.constant 0 : i32
    return %arg0, %c0_i32 : i32, i32
  }
}

</mosaic_0001>

<bundles_post_ra>
// kernel: tpu_custom_call.1
= control target key start
LH: loop header
LB: loop body
LE: loop exit
PB: predicated region body
PF: predicated region fallthrough
CT: control target
= control target key end

     0   :  { %vm39_vm0 = vcmask 261120   ;;  %vm24_vm1 = vcmask 7168   ;;  %v324_v8 = vmov -inf   ;;  %vm99_vm2 = vcmask 130048   ;;  %s327_s6 = smov 126   ;;  %s445_s1 = inlined_call_operand.vmem [shape: f32[32,16], index: 1, kind: input, shape index: {}]   ;;  %s446_s4 = inlined_call_operand.vmem [shape: f32[1,16], index: 4, kind: input, shape index: {}]   ;;  %s447_s0 = inlined_call_operand.vmem [shape: f32[16,32], index: 0, kind: input, shape index: {}]   ;;  %s448_s3 = inlined_call_operand.vmem [shape: s32[2,16], index: 3, kind: input, shape index: {}]   ;;  %s449_s2 = inlined_call_operand.vmem [shape: s32[16,3], index: 2, kind: input, shape index: {}]   ;;  %s450_s5 = inlined_call_operand.vmem [shape: f32[16,1], index: 5, kind: output, shape index: {}]  }
   0x1   :  { %v38_v0 = vld [vmem:[%s445_s1 + $0x18] sm:$0xff]  ;;  %v37_v1 = vld [vmem:[%s445_s1 + $0x10] sm:$0xff]  ;;  %v31_v2 = vld [vmem:[%s447_s0] sm:$0xff]  ;;  %25 = vst.msk [vmem:[#allocation2] sm:$0xff] %vm24_vm1, %v324_v8  ;;  %v325_v13 = vmov 0   ;;  %v326_v14 = vmov 0.0   ;;  %v171_v25 = vlaneseq }
   0x2   :  { %58 = vmatpush.msra.mxu0 %v38_v0  ;;  %292 = vmatpush.msra.mxu1 %v38_v0  ;;  %v32_v3 = vld [vmem:[%s447_s0 + $0x8] sm:$0xff]  ;;  %v35_v5 = vld [vmem:[%s445_s1] sm:$0xff]  ;;  %v33_v6 = vmul.f32 14.285714, %v31_v2  ;;  %26 = vst.msk [vmem:[#allocation2 + $0x8] sm:$0xff] %vm24_vm1, %v324_v8  ;;  %v328_v45 = vmov 1  }
   0x3   :  { %v36_v4 = vld [vmem:[%s445_s1 + $0x8] sm:$0xff]  ;;  %v34_v7 = vmul.f32 14.285714, %v32_v3  ;;  %302 = vset.pattern.permute.xlu1 %v325_v13  ;;  %304 = vset.pattern.permute.xlu0 %v325_v13  ;;  %27 = vst.msk [vmem:[#allocation3] sm:$0xff] %vm24_vm1, %v326_v14  ;;  %v172_v27 = vshrl.u32 %v171_v25, 7  ;;  %v178_v28 = vand.u32 127, %v171_v25 }
   0x4   :  { %59 = vmatpush.msra.mxu0 %v37_v1  ;;  %293 = vmatpush.msra.mxu1 %v37_v1  ;;  %28 = vst.msk [vmem:[#allocation3 + $0x8] sm:$0xff] %vm24_vm1, %v326_v14  ;;  %v70_v41 = vld [vmem:[%s449_s2 + $0x8] sm:$0xff]  ;;  %v69_v42 = vld [vmem:[%s449_s2] sm:$0xff] }
   0x5   :  { %303 = vset.pattern.permute.xlu2 %v325_v13  ;;  %29 = vst.msk [vmem:[#allocation4] sm:$0xff] %vm24_vm1, %v326_v14  ;;  %vm181_vm3 = vcmp.eq.s32.totalorder %v172_v27, %v178_v28  ;;  %v173_v36 = vadd.s32 8, %v172_v27  ;;  %v410_v43 = vcvt.s32.f32 %v69_v42  ;;  %v306_v1 = vld [vmem:[%s448_s3] ss:$0 sm:$0xff]  ;;  %v307_v3 = vld [vmem:[%s448_s3 + $0x1] ss:$0 sm:$0xff] }
   0x6   :  { %60 = vmatpush.msra.mxu0 %v36_v4  ;;  %294 = vmatpush.msra.mxu1 %v36_v4  ;;  %30 = vst.msk [vmem:[#allocation4 + $0x8] sm:$0xff] %vm24_vm1, %v326_v14  ;;  %s329_s3 = smov 2  }
   0x7   :  { %vm182_vm4 = vcmp.eq.s32.totalorder %v173_v36, %v178_v28  ;;  %vm214_vm5 = vcmp.eq.f32.partialorder %v410_v43, 0.0 }
   0x8   :  { %61 = vmatpush.msra.mxu0 %v35_v5  ;;  %295 = vmatpush.msra.mxu1 %v35_v5  ;;  %v97_v15 = vld [vmem:[#allocation2] sm:$0xff]  ;;  %v216_v44 = vsel %vm214_vm5, 1.0, %v410_v43 }
   0x9   :  { %288 = vmatmul.msk.f32.vlgmr.msra.gmra.mxu0 %vm39_vm0, %v33_v6  ;;  %289 = vmatmul.msk.f32.vlgmr.msra.gmra.mxu1 %vm39_vm0, %v34_v7  ;;  %v98_v19 = vld [vmem:[#allocation2 + $0x8] sm:$0xff] }
   0xa   :  { %v130_v49 = vld [vmem:[#allocation3] sm:$0xff] }
   0xb   :  { %v131_v54 = vld [vmem:[#allocation3 + $0x8] sm:$0xff] }
  0x86   :  { %v380_v9 = vpop.f32.mrf.mxu0  ;;  %v384_v11 = vpop.f32.mrf.mxu1 }
  0x87   :  { %v100_v10 = vsel %vm99_vm2, %v380_v9, -inf  ;;  %v103_v12 = vsel %vm99_vm2, %v384_v11, -inf }
  0x88   :  { %101 = vmax.xlane.f32.xlu0 %v100_v10 }
  0x90   :  { %104 = vmax.xlane.f32.xlu0 %v103_v12 }
  0xfb   :  { %v102_v16 = vpop.xlane.xlu0 %101 }
  0xfc   :  { %v106_v17 = vmax.f32 %v97_v15, %v102_v16 }
  0xfe   :  { %v108_v18 = vsub.f32 %v97_v15, %v106_v17  ;;  %145 = vst.msk [vmem:[#allocation2] sm:$0xff] %vm24_vm1, %v106_v17  ;;  %116 = vperm.xlu1 %302, %v106_v17  }
 0x100   :  { %v110_v46 = vmul.f32 1.442695, %v108_v18  ;;  %v213_v18 = vcvt.s32.f32 %v70_v41 }
 0x102   :  { %vm215_vm9 = vcmp.eq.f32.partialorder %v213_v18, 0.0 }
 0x103   :  { %v105_v20 = vpop.xlane.xlu0 %104 }
 0x104   :  { %v107_v21 = vmax.f32 %v98_v19, %v105_v20 }
 0x105   :  { %v200_v16 = vld [vmem:[#allocation2] sm:$0xff] }
 0x106   :  { %v109_v22 = vsub.f32 %v98_v19, %v107_v21  ;;  %146 = vst.msk [vmem:[#allocation2 + $0x8] sm:$0xff] %vm24_vm1, %v107_v21  ;;  %121 = vperm.xlu1 %302, %v107_v21  }
 0x108   :  { %v112_v47 = vmul.f32 1.442695, %v109_v22  ;;  %v217_v22 = vsel %vm215_vm9, 1.0, %v213_v18 }
 0x10d   :  { %v201_v21 = vld [vmem:[#allocation2 + $0x8] sm:$0xff] }
 0x170   :  { %v117_v23 = vpop.permute.xlu1 %116 }
 0x171   :  { %v124_v24 = vsub.f32 %v380_v9, %v117_v23 }
 0x173   :  { %v126_v26 = vmul.f32 1.442695, %v124_v24 }
 0x175   :  { %308 = vpow2.f32 %v126_v26 }
 0x178   :  { %v122_v29 = vpop.permute.xlu1 %121 }
 0x179   :  { %v125_v30 = vsub.f32 %v384_v11, %v122_v29 }
 0x17b   :  { %v309_v31 = vpop.eup %308  ;;  %v128_v32 = vmul.f32 1.442695, %v125_v30 }
 0x17c   :  { %v134_v33 = vsel %vm99_vm2, %v309_v31, 0.0  ;;  %v183_v34 = vsel %vm181_vm3, %v309_v31, 0.0  ;;  %v147_v31 = vld [vmem:[#allocation4] sm:$0xff] }
 0x17d   :  { %310 = vpow2.f32 %v128_v32  ;;  %135 = vadd.xlane.f32.xlu2 %v134_v33  ;;  %v187_v35 = vsel %vm99_vm2, %v183_v34, 0.0 }
 0x17e   :  { %188 = vadd.xlane.f32.xlu0 %v187_v35  ;;  %312 = vpow2.f32 %v110_v46 }
 0x17f   :  { %314 = vpow2.f32 %v112_v47 }
 0x183   :  { %v311_v37 = vpop.eup %310 }
 0x184   :  { %v137_v38 = vsel %vm99_vm2, %v311_v37, 0.0  ;;  %v184_v39 = vsel %vm182_vm4, %v311_v37, 0.0  ;;  %v313_v48 = vpop.eup %312 }
 0x185   :  { %138 = vadd.xlane.f32.xlu2 %v137_v38  ;;  %v190_v40 = vsel %vm99_vm2, %v184_v39, 0.0  ;;  %v132_v50 = vmul.f32 %v313_v48, %v130_v49  ;;  %v315_v53 = vpop.eup %314 }
 0x186   :  { %191 = vadd.xlane.f32.xlu1 %v190_v40  ;;  %v133_v55 = vmul.f32 %v315_v53, %v131_v54 }
 0x192   :  { %77 = vperm.xlu0 %304, %v70_v41  }
 0x19a   :  { %244 = vrot.lane.b32.xlu0 %v216_v44, %s327_s6 }
 0x19d   :  { %74 = vperm.xlu2 %303, %v69_v42  }
 0x1a5   :  { %305 = vset.pattern.permute.xlu2 %v328_v45 }
 0x1a6   :  { %83 = vperm.xlu2 %305, %v69_v42  }
 0x1ae   :  { %86 = vperm.xlu2 %305, %v70_v41  }
 0x1f0   :  { %v136_v51 = vpop.xlane.xlu2 %135 }
 0x1f1   :  { %v140_v52 = vadd.f32 %v136_v51, %v132_v50  ;;  %v189_v59 = vpop.xlane.xlu0 %188 }
 0x1f3   :  { %143 = vst.msk [vmem:[#allocation3] sm:$0xff] %vm24_vm1, %v140_v52 }
 0x1f8   :  { %v139_v56 = vpop.xlane.xlu2 %138 }
 0x1f9   :  { %v141_v57 = vadd.f32 %v139_v56, %v133_v55  ;;  %v192_v62 = vpop.xlane.xlu1 %191 }
 0x1fa   :  { %v185_v58 = vld [vmem:[#allocation3] sm:$0xff] }
 0x1fb   :  { %v193_v60 = vsub.f32 %v185_v58, %v189_v59  ;;  %144 = vst.msk [vmem:[#allocation3 + $0x8] sm:$0xff] %vm24_vm1, %v141_v57 }
 0x1fd   :  { %195 = vst.msk [vmem:[#allocation3] sm:$0xff] %vm24_vm1, %v193_v60 }
 0x200   :  { %v75_v61 = vpop.permute.xlu2 %74 }
 0x201   :  { %vm80_vm6 = vcmp.eq.s32.totalorder %v75_v61, %v306_v1 }
 0x202   :  { %v186_v63 = vld [vmem:[#allocation3 + $0x8] sm:$0xff] }
 0x203   :  { %v194_v0 = vsub.f32 %v186_v63, %v192_v62 }
 0x204   :  { %v202_v2 = vld [vmem:[#allocation3] sm:$0xff]  ;;  %v78_v24 = vpop.permute.xlu0 %77 }
 0x205   :  { %196 = vst.msk [vmem:[#allocation3 + $0x8] sm:$0xff] %vm24_vm1, %v194_v0  ;;  %v204_v4 = vadd.f32 1e-09, %v202_v2  ;;  %vm81_vm11 = vcmp.eq.s32.totalorder %v78_v24, %v306_v1 }
 0x207   :  { %316 = vlog2.f32 %v204_v4 }
 0x208   :  { %v84_v5 = vpop.permute.xlu2 %83 }
 0x209   :  { %vm89_vm7 = vcmp.ne.s32.totalorder %v84_v5, %v307_v3 }
 0x20a   :  { %vm91_vm8 = vmand %vm80_vm6, %vm89_vm7 }
 0x20b   :  { %v290_v6 = vsel %vm91_vm8, 1.0, %v326_v14 }
 0x20c   :  { %v149_v7 = vmul.f32 %v290_v6, %v380_v9  ;;  %v203_v8 = vld [vmem:[#allocation3 + $0x8] sm:$0xff]  ;;  %v245_v30 = vpop.permute.xlu0 %244 }
 0x20d   :  { %v317_v10 = vpop.eup %316  ;;  %v205_v12 = vadd.f32 1e-09, %v203_v8  ;;  %vm255_vm13 = vweird.f32 %v245_v30  ;;  %v261_v42 = vand.u32 2147483648, %v245_v30  ;;  %v259_v44 = vand.u32 2147483647, %v245_v30 }
 0x20e   :  { %v151_v13 = vsel %vm99_vm2, %v149_v7, 0.0  ;;  %v207_v15 = vmul.f32 0.6931472, %v317_v10 }
 0x20f   :  { %152 = vadd.xlane.f32.xlu0 %v151_v13  ;;  %318 = vlog2.f32 %v205_v12  ;;  %v262_v45 = vor.u32 1.1754944e-38, %v261_v42  ;;  %vm260_vm0 = vcmp.eq.f32.partialorder %v259_v44, 8.507059e+37 }
 0x210   :  { %v220_v17 = vadd.f32 %v207_v15, %v200_v16  ;;  %v87_v9 = vpop.permute.xlu2 %86  ;;  %320 = vrcp.f32 %v245_v30 }
 0x211   :  { %vm90_vm10 = vcmp.ne.s32.totalorder %v87_v9, %v307_v3 }
 0x212   :  { %224 = vrot.lane.b32.xlu2 %v220_v17, %s329_s3  ;;  %vm92_vm12 = vmand %vm81_vm11, %vm90_vm10 }
 0x213   :  { %v291_v25 = vsel %vm92_vm12, 1.0, %v326_v14 }
 0x214   :  { %v150_v26 = vmul.f32 %v291_v25, %v384_v11  ;;  %v148_v11 = vld [vmem:[#allocation4 + $0x8] sm:$0xff] }
 0x215   :  { %v319_v19 = vpop.eup %318 }
 0x216   :  { %v209_v20 = vmul.f32 0.6931472, %v319_v19  ;;  %v154_v27 = vsel %vm99_vm2, %v150_v26, 0.0  ;;  %v321_v38 = vpop.eup %320 }
 0x217   :  { %v251_v39 = vmul.f32 %v321_v38, %v245_v30  ;;  %vm256_vm14 = vweird.f32 %v321_v38 }
 0x218   :  { %v221_v23 = vadd.f32 %v209_v20, %v201_v21  ;;  %vm257_vm15 = vmor %vm255_vm13, %vm256_vm14 }
 0x219   :  { %v252_v40 = vsub.f32 1.0, %v251_v39 }
 0x21a   :  { %226 = vrot.lane.b32.xlu1 %v221_v23, %s329_s3  ;;  %246 = vrot.lane.b32.xlu2 %v217_v22, %s327_s6 }
 0x21b   :  { %v253_v41 = vmul.f32 %v321_v38, %v252_v40 }
 0x243   :  { %155 = vadd.xlane.f32.xlu2 %v154_v27 }
 0x26c   :  { %v225_v28 = vpop.permute.xlu2 %224 }
 0x26d   :  { %v230_v29 = vmul.f32 %v225_v28, %v410_v43  ;;  %v254_v43 = vadd.f32 %v321_v38, %v253_v41 }
 0x26f   :  { %234 = vrot.lane.b32.xlu1 %v230_v29, %s327_s6  ;;  %v258_v46 = vsel %vm257_vm15, %v321_v38, %v254_v43 }
 0x270   :  { %v263_v50 = vsel %vm260_vm0, %v262_v45, %v258_v46 }
 0x274   :  { %v247_v14 = vpop.permute.xlu2 %246 }
 0x275   :  { %322 = vrcp.f32 %v247_v14  ;;  %vm270_vm2 = vweird.f32 %v247_v14  ;;  %v276_v57 = vand.u32 2147483648, %v247_v14  ;;  %v274_v59 = vand.u32 2147483647, %v247_v14 }
 0x277   :  { %v277_v60 = vor.u32 1.1754944e-38, %v276_v57  ;;  %vm275_vm5 = vcmp.eq.f32.partialorder %v274_v59, 8.507059e+37 }
 0x27b   :  { %v323_v53 = vpop.eup %322 }
 0x27c   :  { %v266_v54 = vmul.f32 %v323_v53, %v247_v14  ;;  %vm271_vm3 = vweird.f32 %v323_v53 }
 0x27d   :  { %vm272_vm4 = vmor %vm270_vm2, %vm271_vm3 }
 0x27e   :  { %v267_v55 = vsub.f32 1.0, %v266_v54 }
 0x280   :  { %v268_v56 = vmul.f32 %v323_v53, %v267_v55 }
 0x282   :  { %v153_v32 = vpop.xlane.xlu0 %152  ;;  %v269_v58 = vadd.f32 %v323_v53, %v268_v56 }
 0x283   :  { %v157_v33 = vadd.f32 %v153_v32, %v147_v31 }
 0x284   :  { %v273_v61 = vsel %vm272_vm4, %v323_v53, %v269_v58 }
 0x285   :  { %159 = vst.msk [vmem:[#allocation4] sm:$0xff] %vm24_vm1, %v157_v33  ;;  %v278_v1 = vsel %vm275_vm5, %v277_v60, %v273_v61 }
 0x28c   :  { %v227_v34 = vpop.permute.xlu1 %226  ;;  %v218_v48 = vld [vmem:[#allocation4] sm:$0xff] }
 0x28d   :  { %v231_v35 = vmul.f32 %v227_v34, %v213_v18 }
 0x28f   :  { %236 = vrot.lane.b32.xlu1 %v231_v35, %s327_s6 }
 0x2b6   :  { %v156_v36 = vpop.xlane.xlu2 %155 }
 0x2b7   :  { %v158_v37 = vadd.f32 %v156_v36, %v148_v11 }
 0x2b9   :  { %160 = vst.msk [vmem:[#allocation4 + $0x8] sm:$0xff] %vm24_vm1, %v158_v37 }
 0x2c0   :  { %v219_v63 = vld [vmem:[#allocation4 + $0x8] sm:$0xff] }
 0x2e1   :  { %v235_v47 = vpop.permute.xlu1 %234 }
 0x2e2   :  { %v240_v49 = vsub.f32 %v218_v48, %v235_v47 }
 0x2e4   :  { %v264_v51 = vmul.f32 %v263_v50, %v240_v49 }
 0x2e6   :  { %v280_v52 = vsub.f32 0.0, %v264_v51 }
 0x2e8   :  { %282 = vst.msk [vmem:[%s450_s5] sm:$0xff] %vm24_vm1, %v280_v52 }
 0x301   :  { %v237_v62 = vpop.permute.xlu1 %236 }
 0x302   :  { %v241_v0 = vsub.f32 %v219_v63, %v237_v62 }
 0x304   :  { %v279_v2 = vmul.f32 %v278_v1, %v241_v0 }
 0x306   :  { %v281_v3 = vsub.f32 0.0, %v279_v2 }
 0x308   :  { %283 = vst.msk [vmem:[%s450_s5 + $0x8] sm:$0xff] %vm24_vm1, %v281_v3 }

</bundles_post_ra>
